<compile_context>
chip_gen: v5e
topology: v5e:2x2
jax: 0.10.0
libtpu: 0.0.40
codegen_flags: <defaults>
</compile_context>

<pallas_src>
import jax
import jax.numpy as jnp
from jax import lax
from jax.experimental import pallas as pl
from jax.experimental.pallas import tpu as pltpu

IN_CH = 4    # in_channel of Scale_Down
OUT_CH = 8   # out_channel of Scale_Down
SEQ = 32     # sequence length (even, so the stride-2 output is SEQ // 2)


# ----------------------- weight pre-packing (wrapper) -----------------------
def build_causal_operator(w_oik, L, dilation, stride=1):
    """Pack an (O, I, K) causal-dilated-conv weight into a dense operator.

    Returns M of shape (I*L, O*Lo) with
        out[o, j] = sum_{i, t} x[i, t] * M[i*L + t, o*Lo + j]
    equal to PyTorch's Conv1d(..., bias=False)(F.pad(x, ((K-1)*dilation, 0))).
    Pure weight transform; no activation data involved.
    """
    O, I, K = w_oik.shape
    Lo = (L - 1) // stride + 1
    t = jnp.arange(L)[:, None]                       # (L, 1)  input position
    j = jnp.arange(Lo)[None, :]                      # (1, Lo) output position
    delta = j * stride - t                           # (L, Lo)
    k = (K - 1) - delta // dilation                  # tap hitting (t, j)
    valid = (delta >= 0) & (delta % dilation == 0) & (k >= 0) & (k < K)
    k_safe = jnp.clip(k, 0, K - 1)
    wt = w_oik[:, :, k_safe]                         # (O, I, L, Lo)
    wt = jnp.where(valid[None, None], wt, jnp.zeros((), w_oik.dtype))
    return jnp.transpose(wt, (1, 2, 0, 3)).reshape(I * L, O * Lo)


def build_fused_operator(w1, w11, w12, w2, L):
    """Compose conv1 -> conv1_1 -> conv1_2 -> conv2 into one (C*L, L//2) map."""
    m1 = build_causal_operator(w1, L, dilation=1)             # (C*L, 8*L)
    m11 = build_causal_operator(w11, L, dilation=2)           # (8*L, 8*L)
    m12 = build_causal_operator(w12, L, dilation=4)           # (8*L, 8*L)
    m2 = build_causal_operator(w2, L, dilation=1, stride=2)   # (8*L, L//2)
    return m1 @ m11 @ m12 @ m2                                # (C*L, L//2)


# --------------------------------- kernel -----------------------------------
def scale_down_kernel(w_ref, x_ref, o_ref):
    # w: (Lo, C*L) resident fused operator; x: (C*L, nb) batch-on-lanes slab.
    o = jnp.dot(w_ref[...], x_ref[...], preferred_element_type=jnp.float32)
    o_ref[...] = jnp.tanh(o)                                  # (Lo, nb), lane-dense


def _round_up(a, m):
    return ((a + m - 1) // m) * m


def scale_down(x, w1, w11, w12, w2):
    """x: (N, IN_CH, L) f32; weights in PyTorch OIK layout (O, I, K)."""
    N, C, L = x.shape

    m_total = build_fused_operator(w1, w11, w12, w2, L)       # (C*L, Lo)
    CL, Lo = m_total.shape
    wt = m_total.T                                            # (Lo, C*L) = (16, 128)

    # Batch-on-lanes: row index = chan*L + time, column = batch element.
    x2d = jnp.transpose(x, (1, 2, 0)).reshape(CL, N)

    # Lane-friendly batch padding / block size.
    if N <= 512:
        nb = _round_up(max(N, 128), 128)   # one step, >= 128 dense output lanes
        n_pad = nb
    else:
        nb = 512                           # >= 2 "parallel" steps (v7x megacore)
        n_pad = _round_up(N, nb)
    if n_pad != N:
        x2d = jnp.pad(x2d, ((0, 0), (0, n_pad - N)))

    out2d = pl.pallas_call(
        scale_down_kernel,
        out_shape=jax.ShapeDtypeStruct((Lo, n_pad), jnp.float32),
        grid=(n_pad // nb,),
        in_specs=[
            pl.BlockSpec((Lo, CL), lambda b: (0, 0)),   # resident fused weight (~8 KiB)
            pl.BlockSpec((CL, nb), lambda b: (0, b)),   # activation slab
        ],
        out_specs=pl.BlockSpec((Lo, nb), lambda b: (0, b)),
        compiler_params=pltpu.CompilerParams(dimension_semantics=("parallel",)),
    )(wt, x2d)

    return out2d[:, :N].T.reshape(N, 1, Lo)


# ---------------- pure-JAX reference (for correctness check) ----------------
def _ref_causal_conv(x, w_oik, dilation, stride=1):
    K = w_oik.shape[-1]
    pad = (K - 1) * dilation
    xp = jnp.pad(x, ((0, 0), (0, 0), (pad, 0)))
    return lax.conv_general_dilated(
        xp, w_oik, window_strides=(stride,), padding="VALID",
        rhs_dilation=(dilation,), dimension_numbers=("NCH", "OIH", "NCH"))


def ref_forward(x, w1, w11, w12, w2):
    h = _ref_causal_conv(x, w1, 1)
    h = _ref_causal_conv(h, w11, 2)
    h = _ref_causal_conv(h, w12, 4)
    return jnp.tanh(_ref_causal_conv(h, w2, 1, stride=2))


if __name__ == "__main__":
    key = jax.random.PRNGKey(0)
    kx, k1, k2, k3, k4 = jax.random.split(key, 5)

    # deterministic synthetic parameters (PyTorch OIK layout, bias=False)
    x = jax.random.normal(kx, (2, IN_CH, SEQ), jnp.float32)
    w1 = jax.random.normal(k1, (OUT_CH, IN_CH, 4), jnp.float32) * 0.2
    w11 = jax.random.normal(k2, (OUT_CH, OUT_CH, 4), jnp.float32) * 0.2
    w12 = jax.random.normal(k3, (OUT_CH, OUT_CH, 4), jnp.float32) * 0.2
    w2 = jax.random.normal(k4, (1, OUT_CH, 16), jnp.float32) * 0.2

    out = scale_down(x, w1, w11, w12, w2)
    out = jax.block_until_ready(out)

    ref = ref_forward(x, w1, w11, w12, w2)
    assert out.shape == ref.shape == (2, 1, SEQ // 2), (out.shape, ref.shape)
    assert jnp.allclose(out, ref, atol=1e-3, rtol=1e-3)
    print("KERNEL_OK")
</pallas_src>

<mosaic_0001>
module attributes {stable_mosaic.version = 11 : i64} {
  func.func @scale_down_kernel(%arg0: i32, %arg1: memref<16x128xf32, #tpu.memory_space<vmem>>, %arg2: memref<128x128xf32, #tpu.memory_space<vmem>>, %arg3: memref<16x128xf32, #tpu.memory_space<vmem>>) attributes {dimension_semantics = [#tpu.dimension_semantics<parallel>], iteration_bounds = array<i64: 1>, scalar_prefetch = 0 : i64, scratch_operands = 0 : i64, tpu.core_type = #tpu.core_type<tc>, window_params = [{pipeline_mode = #tpu.pipeline_mode<synchronous>, transform_indices = @transform_0, window_bounds = array<i64: 16, 128>}, {transform_indices = @transform_1, window_bounds = array<i64: 128, 128>}, {transform_indices = @transform_2, window_bounds = array<i64: 16, 128>}]} {
    %c0 = arith.constant 0 : index
    %c0_0 = arith.constant 0 : index
    %0 = vector.load %arg1[%c0, %c0_0] : memref<16x128xf32, #tpu.memory_space<vmem>>, vector<16x128xf32>
    %c0_1 = arith.constant 0 : index
    %c0_2 = arith.constant 0 : index
    %1 = vector.load %arg2[%c0_1, %c0_2] : memref<128x128xf32, #tpu.memory_space<vmem>>, vector<128x128xf32>
    %cst = arith.constant dense<0.000000e+00> : vector<16x128xf32>
    %2 = tpu.matmul %0, %1, %cst {dimension_numbers = #tpu.dot_dimension_numbers<[1], [0], [0], [1], [0, 0, 1, 1], [], []>} : vector<16x128xf32>, vector<128x128xf32>, vector<16x128xf32> -> vector<16x128xf32>
    %3 = math.tanh %2 : vector<16x128xf32>
    %c0_3 = arith.constant 0 : index
    %c0_4 = arith.constant 0 : index
    %4 = vector.load %arg3[%c0_3, %c0_4] : memref<16x128xf32, #tpu.memory_space<vmem>>, vector<16x128xf32>
    tpu.vector_store %arg3[%c0_3, %c0_4], %3 {strides = array<i32>} : memref<16x128xf32, #tpu.memory_space<vmem>>, vector<16x128xf32>,
    return
  }
  func.func @transform_0(%arg0: i32) -> (i32, i32) {
    %c0_i32 = arith.constant 0 : i32
    %c0_i32_0 = arith.constant 0 : i32
    %c0_i32_1 = arith.constant 0 : i32
    return %c0_i32, %c0_i32_0 : i32, i32
  }
  func.func @transform_1(%arg0: i32) -> (i32, i32) {
    %c0_i32 = arith.constant 0 : i32
    %c0_i32_0 = arith.constant 0 : i32
    return %c0_i32, %arg0 : i32, i32
  }
  func.func @transform_2(%arg0: i32) -> (i32, i32) {
    %c0_i32 = arith.constant 0 : i32
    %c0_i32_0 = arith.constant 0 : i32
    return %c0_i32, %arg0 : i32, i32
  }
}

</mosaic_0001>

<bundles_post_ra>
// kernel: tpu_custom_call.1
= control target key start
LH: loop header
LB: loop body
LE: loop exit
PB: predicated region body
PF: predicated region fallthrough
CT: control target
= control target key end

     0   :  { %7 = vsyncpa [#allocation3], 0  ;;  %s250_s0 = inlined_call_operand.hbm [shape: f32[16,128], index: 0, kind: input, shape index: {}]   ;;  %s251_s1 = inlined_call_operand.hbm [shape: f32[128,128], index: 1, kind: input, shape index: {}]   ;;  %s252_s2 = inlined_call_operand.hbm [shape: f32[16,128], index: 2, kind: output, shape index: {}]  }
   0x1   :  { %8 = vsyncpa [#allocation6], 0 }
   0x2   :  { %9 = vsyncpa [#allocation4], 0  ;;  %s14_s11 = sshll.u32 %s250_s0, 4  ;;  %s212_s12 = smov [#allocation2]   ;;  %s15_s11 = int_to_ptr.hbm [resolvable:$true] %s14_s11 }
   0x3   :  { %s16_s13 = sshll.u32 %s212_s12, 4  ;;  %s27_s16 = sshll.u32 %s251_s1, 4  ;;  %s17_s13 = int_to_ptr.vmem [resolvable:$true] %s16_s13  ;;  %s28_s16 = int_to_ptr.hbm [resolvable:$true] %s27_s16 }
   0x4   :  { %s213_s17 = smov 128   ;;  %s214_s18 = smov 8  }
   0x5   :  { %22 = dma.hbm_to_vmem [thread:$0]  %s15_s11, 256, %s17_s13, [#allocation3], %s213_s17, %s213_s17, %s214_s18  }
   0x6   :  { %s215_s19 = smov [#allocation5]  }
   0x7   :  { %s29_s20 = sshll.u32 %s215_s19, 4  ;;  %s30_s20 = int_to_ptr.vmem [resolvable:$true] %s29_s20 }
   0x8   :  { %35 = dma.hbm_to_vmem [thread:$0]  %s28_s16, 2048, %s30_s20, [#allocation6], %s213_s17, %s213_s17, %s214_s18  }
   0x9   :  { %206 = dma.done.wait [#allocation3], 256  }
   0xa   :  { %207 = vsyncadd [#allocation3], 4294967040 }
   0xb   :  { %208 = dma.done.wait [#allocation6], 2048  }
   0xc   :  { %209 = vsyncadd [#allocation6], 4294965248  ;;  %v61_v0 = vld [vmem:[#allocation5 + $0x78] sm:$0xff]  ;;  %v60_v1 = vld [vmem:[#allocation5 + $0x70] sm:$0xff]  ;;  %s216_s0 = smov [#allocation7]   ;;  %s95_s23 = sshll.u32 %s252_s2, 4  ;;  %s96_s23 = int_to_ptr.hbm [resolvable:$true] %s95_s23 }
   0xd   :  { %62 = vmatpush.msra.mxu0 %v61_v0  ;;  %109 = vmatpush.msra.mxu1 %v61_v0  ;;  %v59_v2 = vld [vmem:[#allocation5 + $0x68] sm:$0xff]  ;;  %v58_v3 = vld [vmem:[#allocation5 + $0x60] sm:$0xff]  ;;  %v57_v4 = vld [vmem:[#allocation5 + $0x58] sm:$0xff]  ;;  %s93_s1 = sshll.u32 %s216_s0, 4  ;;  %s94_s1 = int_to_ptr.vmem [resolvable:$true] %s93_s1 }
   0xe   :  { %v56_v5 = vld [vmem:[#allocation5 + $0x50] sm:$0xff]  ;;  %v55_v6 = vld [vmem:[#allocation5 + $0x48] sm:$0xff]  ;;  %v54_v7 = vld [vmem:[#allocation5 + $0x40] sm:$0xff] }
   0xf   :  { %63 = vmatpush.msra.mxu0 %v60_v1  ;;  %110 = vmatpush.msra.mxu1 %v60_v1  ;;  %v53_v8 = vld [vmem:[#allocation5 + $0x38] sm:$0xff]  ;;  %v52_v9 = vld [vmem:[#allocation5 + $0x30] sm:$0xff]  ;;  %v51_v10 = vld [vmem:[#allocation5 + $0x28] sm:$0xff] }
  0x10   :  { %v50_v11 = vld [vmem:[#allocation5 + $0x20] sm:$0xff]  ;;  %v49_v12 = vld [vmem:[#allocation5 + $0x18] sm:$0xff]  ;;  %v48_v13 = vld [vmem:[#allocation5 + $0x10] sm:$0xff] }
  0x11   :  { %64 = vmatpush.msra.mxu0 %v59_v2  ;;  %111 = vmatpush.msra.mxu1 %v59_v2  ;;  %v47_v14 = vld [vmem:[#allocation5 + $0x8] sm:$0xff]  ;;  %v46_v15 = vld [vmem:[#allocation5] sm:$0xff]  ;;  %v44_v16 = vld [vmem:[#allocation2] sm:$0xff] }
  0x12   :  { %v45_v17 = vld [vmem:[#allocation2 + $0x8] sm:$0xff] }
  0x13   :  { %65 = vmatpush.msra.mxu0 %v58_v3  ;;  %112 = vmatpush.msra.mxu1 %v58_v3 }
  0x15   :  { %66 = vmatpush.msra.mxu0 %v57_v4  ;;  %113 = vmatpush.msra.mxu1 %v57_v4 }
  0x17   :  { %67 = vmatpush.msra.mxu0 %v56_v5  ;;  %114 = vmatpush.msra.mxu1 %v56_v5 }
  0x19   :  { %68 = vmatpush.msra.mxu0 %v55_v6  ;;  %115 = vmatpush.msra.mxu1 %v55_v6 }
  0x1b   :  { %69 = vmatpush.msra.mxu0 %v54_v7  ;;  %116 = vmatpush.msra.mxu1 %v54_v7 }
  0x1d   :  { %70 = vmatpush.msra.mxu0 %v53_v8  ;;  %117 = vmatpush.msra.mxu1 %v53_v8 }
  0x1f   :  { %71 = vmatpush.msra.mxu0 %v52_v9  ;;  %118 = vmatpush.msra.mxu1 %v52_v9 }
  0x21   :  { %72 = vmatpush.msra.mxu0 %v51_v10  ;;  %119 = vmatpush.msra.mxu1 %v51_v10 }
  0x23   :  { %73 = vmatpush.msra.mxu0 %v50_v11  ;;  %120 = vmatpush.msra.mxu1 %v50_v11 }
  0x25   :  { %74 = vmatpush.msra.mxu0 %v49_v12  ;;  %121 = vmatpush.msra.mxu1 %v49_v12 }
  0x27   :  { %75 = vmatpush.msra.mxu0 %v48_v13  ;;  %122 = vmatpush.msra.mxu1 %v48_v13 }
  0x29   :  { %76 = vmatpush.msra.mxu0 %v47_v14  ;;  %123 = vmatpush.msra.mxu1 %v47_v14 }
  0x2b   :  { %77 = vmatpush.msra.mxu0 %v46_v15  ;;  %124 = vmatpush.msra.mxu1 %v46_v15 }
  0x2c   :  { %78 = vmatmul.f32.vlgmr.msra.gmra.mxu0 %v44_v16  ;;  %81 = vmatmul.f32.vlgmr.msra.gmra.mxu1 %v45_v17 }
  0xa9   :  { %v79_v18 = vpop.f32.mrf.mxu0  ;;  %v82_v19 = vpop.f32.mrf.mxu1 }
  0xaa   :  { %130 = vtanh.f32 %v79_v18 }
  0xab   :  { %132 = vtanh.f32 %v82_v19 }
  0xb0   :  { %v131_v20 = vpop.eup %130 }
  0xb1   :  { %v133_v21 = vpop.eup %132  ;;  %87 = vst [vmem:[#allocation7] sm:$0xff] %v131_v20 }
  0xb2   :  { %88 = vst [vmem:[#allocation7 + $0x8] sm:$0xff] %v133_v21 }
  0xb3   :  { %101 = dma.vmem_to_hbm [thread:$0]  %s94_s1, 256, %s96_s23, [#allocation4], %s213_s17, %s213_s17, %s214_s18  }
  0xb4   :  { %210 = dma.done.wait [#allocation4], 256  }
  0xb5   :  { %211 = vsyncadd [#allocation4], 4294967040 }
  0xb6   :  { %106 = vsyncpa [#allocation3], 1 }
  0xb7   :  { %107 = vsyncpa [#allocation6], 1 }
  0xb8   :  { %108 = vsyncpa [#allocation4], 1 }

</bundles_post_ra>
